<compile_context>
chip_gen: v5e
topology: v5e:2x2
jax: 0.10.0
libtpu: 0.0.40
codegen_flags: <defaults>
</compile_context>

<pallas_src>
from functools import partial

import jax
import jax.numpy as jnp
from jax.experimental import pallas as pl
from jax.experimental.pallas import tpu as pltpu


def _round_up(x, m):
    return ((x + m - 1) // m) * m


def _choose_tile(n, preferred):
    """Multiple-of-8 sequence tile; whole (rounded-up) sequence if it fits `preferred`."""
    n8 = _round_up(max(n, 1), 8)
    return n8 if n8 <= preferred else preferred


def _vmem_limit(working_set_bytes):
    """Explicit scoped-VMEM limit: generous headroom, capped for v7x's 64 MiB physical."""
    return int(max(32 * 1024 * 1024, min(2 * working_set_bytes + (4 << 20), 60 * 1024 * 1024)))


# ---------------------------------------------------------------------------
# One-time parameter preparation (do NOT call per forward step).
# ---------------------------------------------------------------------------
def prepare_params(w_qkv, w_proj, b_proj, num_heads, compute_dtype=jnp.bfloat16):
    """Re-lay-out nn.Linear weights for the kernels.

    w_qkv : (3C, C)   nn.Linear(dim, 3*dim).weight  (qkv_bias=False)
    w_proj: (C, C), b_proj: (C,)
    compute_dtype: bf16 by default (MXU-native on v5e/v6e/v7x; accumulation stays f32).
    """
    three_c, C = w_qkv.shape
    assert three_c == 3 * C and C % num_heads == 0
    H = num_heads
    hd = C // H
    c_pad = _round_up(C, 128)          # lane-dense output channels for the fused proj
    scale = hd ** (-0.5)
    cdtype = compute_dtype

    w = w_qkv.reshape(3, H, hd, C)                        # [qkv, head, d, c_in]
    # (H, C, hd); 1/sqrt(hd) folded into the Q weights (saves a per-tile VPU multiply).
    wq = (jnp.transpose(w[0], (0, 2, 1)) * scale).astype(cdtype)
    wk = jnp.transpose(w[1], (0, 2, 1)).astype(cdtype)
    wv = jnp.transpose(w[2], (0, 2, 1)).astype(cdtype)

    # Output projection: y[c_out] = sum_{h,d} ctx[h, d] * w_proj[c_out, h*hd + d]
    wp = jnp.transpose(w_proj.reshape(C, H, hd), (1, 2, 0))          # (H, hd, C)
    wp = jnp.pad(wp, [(0, 0), (0, 0), (0, c_pad - C)]).astype(cdtype)
    bp = jnp.pad(b_proj, (0, c_pad - C)).reshape(1, c_pad).astype(jnp.float32)

    return dict(wq=wq, wk=wk, wv=wv, wp=wp, bp=bp,
                H=H, hd=hd, C=C, c_pad=c_pad, dtype=cdtype)


# ---------------------------------------------------------------------------
# Kernel 1: QKV projection.  grid = (B, seq_tiles).
# All per-head weight slabs are VMEM-resident (constant index_map) — no re-streaming.
# Per-head 2D dots avoid any in-kernel head-split relayout of a fused wide matmul.
# ---------------------------------------------------------------------------
def _qkv_proj_kernel(x_ref, wq_ref, wk_ref, wv_ref, q_ref, k_ref, v_ref):
    x = x_ref[0]                                           # (tile, C)
    num_heads = wq_ref.shape[0]
    for h in range(num_heads):                             # static unroll
        q_ref[0, h] = jnp.dot(x, wq_ref[h],
                              preferred_element_type=jnp.float32).astype(q_ref.dtype)
        k_ref[0, h] = jnp.dot(x, wk_ref[h],
                              preferred_element_type=jnp.float32).astype(k_ref.dtype)
        v_ref[0, h] = jnp.dot(x, wv_ref[h],
                              preferred_element_type=jnp.float32).astype(v_ref.dtype)


# ---------------------------------------------------------------------------
# Kernel 2: flash attention (online softmax) + fused output projection + bias.
# grid = (B, q_tiles, kv_tiles); kv axis is the reduction ("arbitrary").
# ---------------------------------------------------------------------------
def _flash_attn_proj_kernel(q_ref, k_ref, v_ref, wp_ref, bp_ref, o_ref,
                            m_sc, l_sc, acc_sc, *, n_valid, n_padded):
    ki = pl.program_id(2)
    tk = k_ref.shape[2]

    @pl.when(ki == 0)
    def _init():
        m_sc[...] = jnp.full_like(m_sc, -jnp.inf)
        l_sc[...] = jnp.zeros_like(l_sc)
        acc_sc[...] = jnp.zeros_like(acc_sc)

    q = q_ref[0]                                           # (H, tq, hd), scale pre-folded
    k = k_ref[0]                                           # (H, tk, hd)
    v = v_ref[0]                                           # (H, tk, hd)

    # Batched per-head QK^T (batch dim on both operands -> no transpose in lowering).
    s = jnp.einsum('hqd,hkd->hqk', q, k,
                   preferred_element_type=jnp.float32)     # (H, tq, tk) f32

    if n_padded > n_valid:                                 # static: mask padded KV columns
        col = jax.lax.broadcasted_iota(jnp.int32, (1, 1, tk), 2) + ki * tk
        s = jnp.where(col < n_valid, s, -1e30)

    m_prev = m_sc[...]
    m_new = jnp.maximum(m_prev, s.max(axis=-1, keepdims=True))
    alpha = jnp.exp(m_prev - m_new)
    p = jnp.exp(s - m_new)

    l_sc[...] = alpha * l_sc[...] + p.sum(axis=-1, keepdims=True)
    acc_sc[...] = alpha * acc_sc[...] + jnp.einsum(
        'hqk,hkd->hqd', p.astype(v.dtype), v, preferred_element_type=jnp.float32)
    m_sc[...] = m_new

    @pl.when(ki == pl.num_programs(2) - 1)
    def _finalize():
        ctx = acc_sc[...] / l_sc[...]                      # exact divide, once per q-tile
        num_heads = acc_sc.shape[0]
        w_dtype = wp_ref.dtype
        y = jnp.dot(ctx[0].astype(w_dtype), wp_ref[0],
                    preferred_element_type=jnp.float32)
        for h in range(1, num_heads):                      # unrolled, unpadded-hd contractions
            y = y + jnp.dot(ctx[h].astype(w_dtype), wp_ref[h],
                            preferred_element_type=jnp.float32)
        o_ref[0] = (y + bp_ref[...]).astype(o_ref.dtype)   # lane-dense (tq, c_pad) store


# ---------------------------------------------------------------------------
# Wrapper
# ---------------------------------------------------------------------------
def attention_forward(x, params, preferred_seq_tile=256):
    """x: (B, N, C). Returns (B, N, C).

    preferred_seq_tile: 256 is a good default (v5e/v6e want 256-512, v7x 128-256; on v7x
    with B == 1 prefer a smaller tile so both TensorCores get q-tiles to shard).
    """
    B, N, C = x.shape
    H, hd, c_pad = params["H"], params["hd"], params["c_pad"]
    assert C == params["C"]
    cdtype = params["dtype"]
    isz = jnp.dtype(cdtype).itemsize
    osz = jnp.dtype(x.dtype).itemsize

    tile = _choose_tile(N, preferred_seq_tile)
    n_pad = _round_up(N, tile)
    s_tiles = n_pad // tile

    x_c = x.astype(cdtype)
    if n_pad != N:
        x_c = jnp.pad(x_c, ((0, 0), (0, n_pad - N), (0, 0)))

    # ---------------- QKV projection ----------------
    proj_ws = (2 * (tile * C + 3 * H * C * hd + 3 * H * tile * hd) * isz
               + 3 * H * tile * hd * 4 + tile * C * 4)
    proj_cost = pl.CostEstimate(
        flops=int(2 * B * n_pad * C * 3 * C),
        transcendentals=0,
        bytes_accessed=int(B * n_pad * C * isz + 3 * C * C * isz + 3 * B * n_pad * C * isz))

    q, k, v = pl.pallas_call(
        _qkv_proj_kernel,
        out_shape=tuple(jax.ShapeDtypeStruct((B, H, n_pad, hd), cdtype) for _ in range(3)),
        grid_spec=pltpu.PrefetchScalarGridSpec(
            num_scalar_prefetch=0,
            grid=(B, s_tiles),
            in_specs=[
                pl.BlockSpec((1, tile, C), lambda b, s: (b, s, 0)),
                pl.BlockSpec((H, C, hd), lambda b, s: (0, 0, 0)),   # constant: VMEM-resident
                pl.BlockSpec((H, C, hd), lambda b, s: (0, 0, 0)),
                pl.BlockSpec((H, C, hd), lambda b, s: (0, 0, 0)),
            ],
            out_specs=[
                pl.BlockSpec((1, H, tile, hd), lambda b, s: (b, 0, s, 0)),
                pl.BlockSpec((1, H, tile, hd), lambda b, s: (b, 0, s, 0)),
                pl.BlockSpec((1, H, tile, hd), lambda b, s: (b, 0, s, 0)),
            ],
        ),
        compiler_params=pltpu.CompilerParams(
            dimension_semantics=("parallel", "parallel"),
            vmem_limit_bytes=_vmem_limit(proj_ws)),
        cost_estimate=proj_cost,
    )(x_c, params["wq"], params["wk"], params["wv"])

    # ---------------- flash attention + fused output projection ----------------
    tq = tk = tile
    flash_ws = (2 * (H * tq * hd + 2 * H * tk * hd + H * hd * c_pad) * isz
                + 2 * c_pad * 4 + 2 * tq * c_pad * osz
                + (2 * H * tq + H * tq * hd) * 4
                + (2 * H * tq * tk + H * tq * hd + 2 * tq * c_pad) * 4)
    flash_cost = pl.CostEstimate(
        flops=int(4 * B * H * n_pad * n_pad * hd + 2 * B * n_pad * C * c_pad),
        transcendentals=int(B * H * n_pad * n_pad),
        bytes_accessed=int(B * H * n_pad * hd * isz * (1 + 2 * s_tiles)
                           + H * hd * c_pad * isz + B * n_pad * c_pad * osz))

    out_p = pl.pallas_call(
        partial(_flash_attn_proj_kernel, n_valid=N, n_padded=n_pad),
        out_shape=jax.ShapeDtypeStruct((B, n_pad, c_pad), x.dtype),
        grid_spec=pltpu.PrefetchScalarGridSpec(
            num_scalar_prefetch=0,
            grid=(B, s_tiles, s_tiles),
            in_specs=[
                pl.BlockSpec((1, H, tq, hd), lambda b, qi, ki: (b, 0, qi, 0)),
                pl.BlockSpec((1, H, tk, hd), lambda b, qi, ki: (b, 0, ki, 0)),
                pl.BlockSpec((1, H, tk, hd), lambda b, qi, ki: (b, 0, ki, 0)),
                pl.BlockSpec((H, hd, c_pad), lambda b, qi, ki: (0, 0, 0)),
                pl.BlockSpec((1, c_pad), lambda b, qi, ki: (0, 0)),
            ],
            out_specs=pl.BlockSpec((1, tq, c_pad), lambda b, qi, ki: (b, qi, 0)),
            scratch_shapes=[
                pltpu.VMEM((H, tq, 1), jnp.float32),       # running max
                pltpu.VMEM((H, tq, 1), jnp.float32),       # running sum
                pltpu.VMEM((H, tq, hd), jnp.float32),      # output accumulator (unpadded hd)
            ],
        ),
        compiler_params=pltpu.CompilerParams(
            dimension_semantics=("parallel", "parallel", "arbitrary"),
            vmem_limit_bytes=_vmem_limit(flash_ws)),
        cost_estimate=flash_cost,
    )(q, k, v, params["wp"], params["bp"])

    out = out_p
    if n_pad != N:
        out = out[:, :N]
    if c_pad != C:
        out = out[..., :C]
    return out


# ---------------------------------------------------------------------------
# Pure-JAX reference mirroring the PyTorch forward exactly.
# ---------------------------------------------------------------------------
def _reference(x, w_qkv, w_proj, b_proj, num_heads):
    B, N, C = x.shape
    hd = C // num_heads
    scale = hd ** (-0.5)
    qkv = jnp.einsum('bnc,oc->bno', x, w_qkv)                       # (B, N, 3C)
    qkv = qkv.reshape(B, N, 3, num_heads, hd).transpose(2, 0, 3, 1, 4)
    q, k, v = qkv[0], qkv[1], qkv[2]                                # (B, H, N, hd)
    q = q * scale
    attn = q @ jnp.swapaxes(k, -2, -1)                              # (B, H, N, N)
    attn = jax.nn.softmax(attn, axis=-1)
    out = (attn @ v).transpose(0, 2, 1, 3).reshape(B, N, C)
    return jnp.einsum('bnc,oc->bno', out, w_proj) + b_proj


if __name__ == "__main__":
    B, N, C = 2, 8, 32
    num_heads = 4                       # head_dim = 8

    key = jax.random.PRNGKey(0)
    kx, kq, kp, kb, kx2 = jax.random.split(key, 5)
    x = jax.random.normal(kx, (B, N, C), dtype=jnp.float32)
    w_qkv = jax.random.normal(kq, (3 * C, C), dtype=jnp.float32) * (1.0 / jnp.sqrt(C))
    w_proj = jax.random.normal(kp, (C, C), dtype=jnp.float32) * (1.0 / jnp.sqrt(C))
    b_proj = jax.random.normal(kb, (C,), dtype=jnp.float32) * 0.01

    # Case 1: bf16 compute (production default), N divisible by the tile.
    params_bf16 = prepare_params(w_qkv, w_proj, b_proj, num_heads)   # bf16 default
    out = jax.block_until_ready(attention_forward(x, params_bf16))
    ref = _reference(x, w_qkv, w_proj, b_proj, num_heads)
    assert out.shape == (B, N, C)
    assert jnp.allclose(out, ref, atol=5e-2, rtol=5e-2), "bf16 path mismatch vs reference"

    # Case 2: f32 compute + ragged sequence (N=19) -> exercises N-padding, KV masking,
    # and the multi-kv-tile online-softmax path with a small tile.
    N2 = 19
    x2 = jax.random.normal(kx2, (B, N2, C), dtype=jnp.float32)
    params_f32 = prepare_params(w_qkv, w_proj, b_proj, num_heads, compute_dtype=jnp.float32)
    out2 = jax.block_until_ready(attention_forward(x2, params_f32, preferred_seq_tile=8))
    ref2 = _reference(x2, w_qkv, w_proj, b_proj, num_heads)
    assert out2.shape == (B, N2, C)
    assert jnp.allclose(out2, ref2, atol=1e-2, rtol=1e-2), "masked/ragged path mismatch"

    print("KERNEL_OK")
</pallas_src>

<mosaic_0001>
module attributes {stable_mosaic.version = 11 : i64} {
  func.func @_qkv_proj_kernel(%arg0: i32, %arg1: i32, %arg2: memref<1x8x32xbf16, #tpu.memory_space<vmem>>, %arg3: memref<4x32x8xbf16, #tpu.memory_space<vmem>>, %arg4: memref<4x32x8xbf16, #tpu.memory_space<vmem>>, %arg5: memref<4x32x8xbf16, #tpu.memory_space<vmem>>, %arg6: memref<1x4x8x8xbf16, #tpu.memory_space<vmem>>, %arg7: memref<1x4x8x8xbf16, #tpu.memory_space<vmem>>, %arg8: memref<1x4x8x8xbf16, #tpu.memory_space<vmem>>) attributes {dimension_semantics = [#tpu.dimension_semantics<parallel>, #tpu.dimension_semantics<parallel>], iteration_bounds = array<i64: 2, 1>, scalar_prefetch = 0 : i64, scratch_operands = 0 : i64, tpu.core_type = #tpu.core_type<tc>, window_params = [{transform_indices = @transform_0, window_bounds = array<i64: 1, 8, 32>}, {pipeline_mode = #tpu.pipeline_mode<synchronous>, transform_indices = @transform_1, window_bounds = array<i64: 4, 32, 8>}, {pipeline_mode = #tpu.pipeline_mode<synchronous>, transform_indices = @transform_2, window_bounds = array<i64: 4, 32, 8>}, {pipeline_mode = #tpu.pipeline_mode<synchronous>, transform_indices = @transform_3, window_bounds = array<i64: 4, 32, 8>}, {transform_indices = @transform_4, window_bounds = array<i64: 1, 4, 8, 8>}, {transform_indices = @transform_5, window_bounds = array<i64: 1, 4, 8, 8>}, {transform_indices = @transform_6, window_bounds = array<i64: 1, 4, 8, 8>}]} {
    %c0 = arith.constant 0 : index
    %c0_0 = arith.constant 0 : index
    %c0_1 = arith.constant 0 : index
    %0 = vector.load %arg2[%c0, %c0_0, %c0_1] : memref<1x8x32xbf16, #tpu.memory_space<vmem>>, vector<1x8x32xbf16>
    %1 = vector.shape_cast %0 : vector<1x8x32xbf16> to vector<8x32xbf16>
    %c0_2 = arith.constant 0 : index
    %c0_3 = arith.constant 0 : index
    %c0_4 = arith.constant 0 : index
    %2 = vector.load %arg3[%c0_2, %c0_3, %c0_4] : memref<4x32x8xbf16, #tpu.memory_space<vmem>>, vector<1x32x8xbf16>
    %3 = vector.shape_cast %2 : vector<1x32x8xbf16> to vector<32x8xbf16>
    %cst = arith.constant dense<0.000000e+00> : vector<8x8xf32>
    %4 = tpu.matmul %1, %3, %cst {dimension_numbers = #tpu.dot_dimension_numbers<[1], [0], [0], [1], [0, 0, 1, 1], [], []>} : vector<8x32xbf16>, vector<32x8xbf16>, vector<8x8xf32> -> vector<8x8xf32>
    %5 = arith.truncf %4 : vector<8x8xf32> to vector<8x8xbf16>
    %c0_5 = arith.constant 0 : index
    %c0_6 = arith.constant 0 : index
    %c0_7 = arith.constant 0 : index
    %c0_8 = arith.constant 0 : index
    %6 = vector.load %arg6[%c0_5, %c0_6, %c0_7, %c0_8] : memref<1x4x8x8xbf16, #tpu.memory_space<vmem>>, vector<1x1x8x8xbf16>
    %7 = vector.shape_cast %6 : vector<1x1x8x8xbf16> to vector<8x8xbf16>
    %8 = vector.shape_cast %5 : vector<8x8xbf16> to vector<1x1x8x8xbf16>
    tpu.vector_store %arg6[%c0_5, %c0_6, %c0_7, %c0_8], %8 {strides = array<i32>} : memref<1x4x8x8xbf16, #tpu.memory_space<vmem>>, vector<1x1x8x8xbf16>,
    %c0_9 = arith.constant 0 : index
    %c0_10 = arith.constant 0 : index
    %c0_11 = arith.constant 0 : index
    %9 = vector.load %arg4[%c0_9, %c0_10, %c0_11] : memref<4x32x8xbf16, #tpu.memory_space<vmem>>, vector<1x32x8xbf16>
    %10 = vector.shape_cast %9 : vector<1x32x8xbf16> to vector<32x8xbf16>
    %cst_12 = arith.constant dense<0.000000e+00> : vector<8x8xf32>
    %11 = tpu.matmul %1, %10, %cst_12 {dimension_numbers = #tpu.dot_dimension_numbers<[1], [0], [0], [1], [0, 0, 1, 1], [], []>} : vector<8x32xbf16>, vector<32x8xbf16>, vector<8x8xf32> -> vector<8x8xf32>
    %12 = arith.truncf %11 : vector<8x8xf32> to vector<8x8xbf16>
    %c0_13 = arith.constant 0 : index
    %c0_14 = arith.constant 0 : index
    %c0_15 = arith.constant 0 : index
    %c0_16 = arith.constant 0 : index
    %13 = vector.load %arg7[%c0_13, %c0_14, %c0_15, %c0_16] : memref<1x4x8x8xbf16, #tpu.memory_space<vmem>>, vector<1x1x8x8xbf16>
    %14 = vector.shape_cast %13 : vector<1x1x8x8xbf16> to vector<8x8xbf16>
    %15 = vector.shape_cast %12 : vector<8x8xbf16> to vector<1x1x8x8xbf16>
    tpu.vector_store %arg7[%c0_13, %c0_14, %c0_15, %c0_16], %15 {strides = array<i32>} : memref<1x4x8x8xbf16, #tpu.memory_space<vmem>>, vector<1x1x8x8xbf16>,
    %c0_17 = arith.constant 0 : index
    %c0_18 = arith.constant 0 : index
    %c0_19 = arith.constant 0 : index
    %16 = vector.load %arg5[%c0_17, %c0_18, %c0_19] : memref<4x32x8xbf16, #tpu.memory_space<vmem>>, vector<1x32x8xbf16>
    %17 = vector.shape_cast %16 : vector<1x32x8xbf16> to vector<32x8xbf16>
    %cst_20 = arith.constant dense<0.000000e+00> : vector<8x8xf32>
    %18 = tpu.matmul %1, %17, %cst_20 {dimension_numbers = #tpu.dot_dimension_numbers<[1], [0], [0], [1], [0, 0, 1, 1], [], []>} : vector<8x32xbf16>, vector<32x8xbf16>, vector<8x8xf32> -> vector<8x8xf32>
    %19 = arith.truncf %18 : vector<8x8xf32> to vector<8x8xbf16>
    %c0_21 = arith.constant 0 : index
    %c0_22 = arith.constant 0 : index
    %c0_23 = arith.constant 0 : index
    %c0_24 = arith.constant 0 : index
    %20 = vector.load %arg8[%c0_21, %c0_22, %c0_23, %c0_24] : memref<1x4x8x8xbf16, #tpu.memory_space<vmem>>, vector<1x1x8x8xbf16>
    %21 = vector.shape_cast %20 : vector<1x1x8x8xbf16> to vector<8x8xbf16>
    %22 = vector.shape_cast %19 : vector<8x8xbf16> to vector<1x1x8x8xbf16>
    tpu.vector_store %arg8[%c0_21, %c0_22, %c0_23, %c0_24], %22 {strides = array<i32>} : memref<1x4x8x8xbf16, #tpu.memory_space<vmem>>, vector<1x1x8x8xbf16>,
    %c1 = arith.constant 1 : index
    %c0_25 = arith.constant 0 : index
    %c0_26 = arith.constant 0 : index
    %23 = vector.load %arg3[%c1, %c0_25, %c0_26] : memref<4x32x8xbf16, #tpu.memory_space<vmem>>, vector<1x32x8xbf16>
    %24 = vector.shape_cast %23 : vector<1x32x8xbf16> to vector<32x8xbf16>
    %cst_27 = arith.constant dense<0.000000e+00> : vector<8x8xf32>
    %25 = tpu.matmul %1, %24, %cst_27 {dimension_numbers = #tpu.dot_dimension_numbers<[1], [0], [0], [1], [0, 0, 1, 1], [], []>} : vector<8x32xbf16>, vector<32x8xbf16>, vector<8x8xf32> -> vector<8x8xf32>
    %26 = arith.truncf %25 : vector<8x8xf32> to vector<8x8xbf16>
    %c0_28 = arith.constant 0 : index
    %c1_29 = arith.constant 1 : index
    %c0_30 = arith.constant 0 : index
    %c0_31 = arith.constant 0 : index
    %27 = vector.load %arg6[%c0_28, %c1_29, %c0_30, %c0_31] : memref<1x4x8x8xbf16, #tpu.memory_space<vmem>>, vector<1x1x8x8xbf16>
    %28 = vector.shape_cast %27 : vector<1x1x8x8xbf16> to vector<8x8xbf16>
    %29 = vector.shape_cast %26 : vector<8x8xbf16> to vector<1x1x8x8xbf16>
    tpu.vector_store %arg6[%c0_28, %c1_29, %c0_30, %c0_31], %29 {strides = array<i32>} : memref<1x4x8x8xbf16, #tpu.memory_space<vmem>>, vector<1x1x8x8xbf16>,
    %c1_32 = arith.constant 1 : index
    %c0_33 = arith.constant 0 : index
    %c0_34 = arith.constant 0 : index
    %30 = vector.load %arg4[%c1_32, %c0_33, %c0_34] : memref<4x32x8xbf16, #tpu.memory_space<vmem>>, vector<1x32x8xbf16>
    %31 = vector.shape_cast %30 : vector<1x32x8xbf16> to vector<32x8xbf16>
    %cst_35 = arith.constant dense<0.000000e+00> : vector<8x8xf32>
    %32 = tpu.matmul %1, %31, %cst_35 {dimension_numbers = #tpu.dot_dimension_numbers<[1], [0], [0], [1], [0, 0, 1, 1], [], []>} : vector<8x32xbf16>, vector<32x8xbf16>, vector<8x8xf32> -> vector<8x8xf32>
    %33 = arith.truncf %32 : vector<8x8xf32> to vector<8x8xbf16>
    %c0_36 = arith.constant 0 : index
    %c1_37 = arith.constant 1 : index
    %c0_38 = arith.constant 0 : index
    %c0_39 = arith.constant 0 : index
    %34 = vector.load %arg7[%c0_36, %c1_37, %c0_38, %c0_39] : memref<1x4x8x8xbf16, #tpu.memory_space<vmem>>, vector<1x1x8x8xbf16>
    %35 = vector.shape_cast %34 : vector<1x1x8x8xbf16> to vector<8x8xbf16>
    %36 = vector.shape_cast %33 : vector<8x8xbf16> to vector<1x1x8x8xbf16>
    tpu.vector_store %arg7[%c0_36, %c1_37, %c0_38, %c0_39], %36 {strides = array<i32>} : memref<1x4x8x8xbf16, #tpu.memory_space<vmem>>, vector<1x1x8x8xbf16>,
    %c1_40 = arith.constant 1 : index
    %c0_41 = arith.constant 0 : index
    %c0_42 = arith.constant 0 : index
    %37 = vector.load %arg5[%c1_40, %c0_41, %c0_42] : memref<4x32x8xbf16, #tpu.memory_space<vmem>>, vector<1x32x8xbf16>
    %38 = vector.shape_cast %37 : vector<1x32x8xbf16> to vector<32x8xbf16>
    %cst_43 = arith.constant dense<0.000000e+00> : vector<8x8xf32>
    %39 = tpu.matmul %1, %38, %cst_43 {dimension_numbers = #tpu.dot_dimension_numbers<[1], [0], [0], [1], [0, 0, 1, 1], [], []>} : vector<8x32xbf16>, vector<32x8xbf16>, vector<8x8xf32> -> vector<8x8xf32>
    %40 = arith.truncf %39 : vector<8x8xf32> to vector<8x8xbf16>
    %c0_44 = arith.constant 0 : index
    %c1_45 = arith.constant 1 : index
    %c0_46 = arith.constant 0 : index
    %c0_47 = arith.constant 0 : index
    %41 = vector.load %arg8[%c0_44, %c1_45, %c0_46, %c0_47] : memref<1x4x8x8xbf16, #tpu.memory_space<vmem>>, vector<1x1x8x8xbf16>
    %42 = vector.shape_cast %41 : vector<1x1x8x8xbf16> to vector<8x8xbf16>
    %43 = vector.shape_cast %40 : vector<8x8xbf16> to vector<1x1x8x8xbf16>
    tpu.vector_store %arg8[%c0_44, %c1_45, %c0_46, %c0_47], %43 {strides = array<i32>} : memref<1x4x8x8xbf16, #tpu.memory_space<vmem>>, vector<1x1x8x8xbf16>,
    %c2 = arith.constant 2 : index
    %c0_48 = arith.constant 0 : index
    %c0_49 = arith.constant 0 : index
    %44 = vector.load %arg3[%c2, %c0_48, %c0_49] : memref<4x32x8xbf16, #tpu.memory_space<vmem>>, vector<1x32x8xbf16>
    %45 = vector.shape_cast %44 : vector<1x32x8xbf16> to vector<32x8xbf16>
    %cst_50 = arith.constant dense<0.000000e+00> : vector<8x8xf32>
    %46 = tpu.matmul %1, %45, %cst_50 {dimension_numbers = #tpu.dot_dimension_numbers<[1], [0], [0], [1], [0, 0, 1, 1], [], []>} : vector<8x32xbf16>, vector<32x8xbf16>, vector<8x8xf32> -> vector<8x8xf32>
    %47 = arith.truncf %46 : vector<8x8xf32> to vector<8x8xbf16>
    %c0_51 = arith.constant 0 : index
    %c2_52 = arith.constant 2 : index
    %c0_53 = arith.constant 0 : index
    %c0_54 = arith.constant 0 : index
    %48 = vector.load %arg6[%c0_51, %c2_52, %c0_53, %c0_54] : memref<1x4x8x8xbf16, #tpu.memory_space<vmem>>, vector<1x1x8x8xbf16>
    %49 = vector.shape_cast %48 : vector<1x1x8x8xbf16> to vector<8x8xbf16>
    %50 = vector.shape_cast %47 : vector<8x8xbf16> to vector<1x1x8x8xbf16>
    tpu.vector_store %arg6[%c0_51, %c2_52, %c0_53, %c0_54], %50 {strides = array<i32>} : memref<1x4x8x8xbf16, #tpu.memory_space<vmem>>, vector<1x1x8x8xbf16>,
    %c2_55 = arith.constant 2 : index
    %c0_56 = arith.constant 0 : index
    %c0_57 = arith.constant 0 : index
    %51 = vector.load %arg4[%c2_55, %c0_56, %c0_57] : memref<4x32x8xbf16, #tpu.memory_space<vmem>>, vector<1x32x8xbf16>
    %52 = vector.shape_cast %51 : vector<1x32x8xbf16> to vector<32x8xbf16>
    %cst_58 = arith.constant dense<0.000000e+00> : vector<8x8xf32>
    %53 = tpu.matmul %1, %52, %cst_58 {dimension_numbers = #tpu.dot_dimension_numbers<[1], [0], [0], [1], [0, 0, 1, 1], [], []>} : vector<8x32xbf16>, vector<32x8xbf16>, vector<8x8xf32> -> vector<8x8xf32>
    %54 = arith.truncf %53 : vector<8x8xf32> to vector<8x8xbf16>
    %c0_59 = arith.constant 0 : index
    %c2_60 = arith.constant 2 : index
    %c0_61 = arith.constant 0 : index
    %c0_62 = arith.constant 0 : index
    %55 = vector.load %arg7[%c0_59, %c2_60, %c0_61, %c0_62] : memref<1x4x8x8xbf16, #tpu.memory_space<vmem>>, vector<1x1x8x8xbf16>
    %56 = vector.shape_cast %55 : vector<1x1x8x8xbf16> to vector<8x8xbf16>
    %57 = vector.shape_cast %54 : vector<8x8xbf16> to vector<1x1x8x8xbf16>
    tpu.vector_store %arg7[%c0_59, %c2_60, %c0_61, %c0_62], %57 {strides = array<i32>} : memref<1x4x8x8xbf16, #tpu.memory_space<vmem>>, vector<1x1x8x8xbf16>,
    %c2_63 = arith.constant 2 : index
    %c0_64 = arith.constant 0 : index
    %c0_65 = arith.constant 0 : index
    %58 = vector.load %arg5[%c2_63, %c0_64, %c0_65] : memref<4x32x8xbf16, #tpu.memory_space<vmem>>, vector<1x32x8xbf16>
    %59 = vector.shape_cast %58 : vector<1x32x8xbf16> to vector<32x8xbf16>
    %cst_66 = arith.constant dense<0.000000e+00> : vector<8x8xf32>
    %60 = tpu.matmul %1, %59, %cst_66 {dimension_numbers = #tpu.dot_dimension_numbers<[1], [0], [0], [1], [0, 0, 1, 1], [], []>} : vector<8x32xbf16>, vector<32x8xbf16>, vector<8x8xf32> -> vector<8x8xf32>
    %61 = arith.truncf %60 : vector<8x8xf32> to vector<8x8xbf16>
    %c0_67 = arith.constant 0 : index
    %c2_68 = arith.constant 2 : index
    %c0_69 = arith.constant 0 : index
    %c0_70 = arith.constant 0 : index
    %62 = vector.load %arg8[%c0_67, %c2_68, %c0_69, %c0_70] : memref<1x4x8x8xbf16, #tpu.memory_space<vmem>>, vector<1x1x8x8xbf16>
    %63 = vector.shape_cast %62 : vector<1x1x8x8xbf16> to vector<8x8xbf16>
    %64 = vector.shape_cast %61 : vector<8x8xbf16> to vector<1x1x8x8xbf16>
    tpu.vector_store %arg8[%c0_67, %c2_68, %c0_69, %c0_70], %64 {strides = array<i32>} : memref<1x4x8x8xbf16, #tpu.memory_space<vmem>>, vector<1x1x8x8xbf16>,
    %c3 = arith.constant 3 : index
    %c0_71 = arith.constant 0 : index
    %c0_72 = arith.constant 0 : index
    %65 = vector.load %arg3[%c3, %c0_71, %c0_72] : memref<4x32x8xbf16, #tpu.memory_space<vmem>>, vector<1x32x8xbf16>
    %66 = vector.shape_cast %65 : vector<1x32x8xbf16> to vector<32x8xbf16>
    %cst_73 = arith.constant dense<0.000000e+00> : vector<8x8xf32>
    %67 = tpu.matmul %1, %66, %cst_73 {dimension_numbers = #tpu.dot_dimension_numbers<[1], [0], [0], [1], [0, 0, 1, 1], [], []>} : vector<8x32xbf16>, vector<32x8xbf16>, vector<8x8xf32> -> vector<8x8xf32>
    %68 = arith.truncf %67 : vector<8x8xf32> to vector<8x8xbf16>
    %c0_74 = arith.constant 0 : index
    %c3_75 = arith.constant 3 : index
    %c0_76 = arith.constant 0 : index
    %c0_77 = arith.constant 0 : index
    %69 = vector.load %arg6[%c0_74, %c3_75, %c0_76, %c0_77] : memref<1x4x8x8xbf16, #tpu.memory_space<vmem>>, vector<1x1x8x8xbf16>
    %70 = vector.shape_cast %69 : vector<1x1x8x8xbf16> to vector<8x8xbf16>
    %71 = vector.shape_cast %68 : vector<8x8xbf16> to vector<1x1x8x8xbf16>
    tpu.vector_store %arg6[%c0_74, %c3_75, %c0_76, %c0_77], %71 {strides = array<i32>} : memref<1x4x8x8xbf16, #tpu.memory_space<vmem>>, vector<1x1x8x8xbf16>,
    %c3_78 = arith.constant 3 : index
    %c0_79 = arith.constant 0 : index
    %c0_80 = arith.constant 0 : index
    %72 = vector.load %arg4[%c3_78, %c0_79, %c0_80] : memref<4x32x8xbf16, #tpu.memory_space<vmem>>, vector<1x32x8xbf16>
    %73 = vector.shape_cast %72 : vector<1x32x8xbf16> to vector<32x8xbf16>
    %cst_81 = arith.constant dense<0.000000e+00> : vector<8x8xf32>
    %74 = tpu.matmul %1, %73, %cst_81 {dimension_numbers = #tpu.dot_dimension_numbers<[1], [0], [0], [1], [0, 0, 1, 1], [], []>} : vector<8x32xbf16>, vector<32x8xbf16>, vector<8x8xf32> -> vector<8x8xf32>
    %75 = arith.truncf %74 : vector<8x8xf32> to vector<8x8xbf16>
    %c0_82 = arith.constant 0 : index
    %c3_83 = arith.constant 3 : index
    %c0_84 = arith.constant 0 : index
    %c0_85 = arith.constant 0 : index
    %76 = vector.load %arg7[%c0_82, %c3_83, %c0_84, %c0_85] : memref<1x4x8x8xbf16, #tpu.memory_space<vmem>>, vector<1x1x8x8xbf16>
    %77 = vector.shape_cast %76 : vector<1x1x8x8xbf16> to vector<8x8xbf16>
    %78 = vector.shape_cast %75 : vector<8x8xbf16> to vector<1x1x8x8xbf16>
    tpu.vector_store %arg7[%c0_82, %c3_83, %c0_84, %c0_85], %78 {strides = array<i32>} : memref<1x4x8x8xbf16, #tpu.memory_space<vmem>>, vector<1x1x8x8xbf16>,
    %c3_86 = arith.constant 3 : index
    %c0_87 = arith.constant 0 : index
    %c0_88 = arith.constant 0 : index
    %79 = vector.load %arg5[%c3_86, %c0_87, %c0_88] : memref<4x32x8xbf16, #tpu.memory_space<vmem>>, vector<1x32x8xbf16>
    %80 = vector.shape_cast %79 : vector<1x32x8xbf16> to vector<32x8xbf16>
    %cst_89 = arith.constant dense<0.000000e+00> : vector<8x8xf32>
    %81 = tpu.matmul %1, %80, %cst_89 {dimension_numbers = #tpu.dot_dimension_numbers<[1], [0], [0], [1], [0, 0, 1, 1], [], []>} : vector<8x32xbf16>, vector<32x8xbf16>, vector<8x8xf32> -> vector<8x8xf32>
    %82 = arith.truncf %81 : vector<8x8xf32> to vector<8x8xbf16>
    %c0_90 = arith.constant 0 : index
    %c3_91 = arith.constant 3 : index
    %c0_92 = arith.constant 0 : index
    %c0_93 = arith.constant 0 : index
    %83 = vector.load %arg8[%c0_90, %c3_91, %c0_92, %c0_93] : memref<1x4x8x8xbf16, #tpu.memory_space<vmem>>, vector<1x1x8x8xbf16>
    %84 = vector.shape_cast %83 : vector<1x1x8x8xbf16> to vector<8x8xbf16>
    %85 = vector.shape_cast %82 : vector<8x8xbf16> to vector<1x1x8x8xbf16>
    tpu.vector_store %arg8[%c0_90, %c3_91, %c0_92, %c0_93], %85 {strides = array<i32>} : memref<1x4x8x8xbf16, #tpu.memory_space<vmem>>, vector<1x1x8x8xbf16>,
    return
  }
  func.func @transform_0(%arg0: i32, %arg1: i32) -> (i32, i32, i32) {
    %c0_i32 = arith.constant 0 : i32
    %c0_i32_0 = arith.constant 0 : i32
    return %arg0, %arg1, %c0_i32 : i32, i32, i32
  }
  func.func @transform_1(%arg0: i32, %arg1: i32) -> (i32, i32, i32) {
    %c0_i32 = arith.constant 0 : i32
    %c0_i32_0 = arith.constant 0 : i32
    %c0_i32_1 = arith.constant 0 : i32
    %c0_i32_2 = arith.constant 0 : i32
    return %c0_i32, %c0_i32_0, %c0_i32_1 : i32, i32, i32
  }
  func.func @transform_2(%arg0: i32, %arg1: i32) -> (i32, i32, i32) {
    %c0_i32 = arith.constant 0 : i32
    %c0_i32_0 = arith.constant 0 : i32
    %c0_i32_1 = arith.constant 0 : i32
    %c0_i32_2 = arith.constant 0 : i32
    return %c0_i32, %c0_i32_0, %c0_i32_1 : i32, i32, i32
  }
  func.func @transform_3(%arg0: i32, %arg1: i32) -> (i32, i32, i32) {
    %c0_i32 = arith.constant 0 : i32
    %c0_i32_0 = arith.constant 0 : i32
    %c0_i32_1 = arith.constant 0 : i32
    %c0_i32_2 = arith.constant 0 : i32
    return %c0_i32, %c0_i32_0, %c0_i32_1 : i32, i32, i32
  }
  func.func @transform_4(%arg0: i32, %arg1: i32) -> (i32, i32, i32, i32) {
    %c0_i32 = arith.constant 0 : i32
    %c0_i32_0 = arith.constant 0 : i32
    %c0_i32_1 = arith.constant 0 : i32
    return %arg0, %c0_i32, %arg1, %c0_i32_0 : i32, i32, i32, i32
  }
  func.func @transform_5(%arg0: i32, %arg1: i32) -> (i32, i32, i32, i32) {
    %c0_i32 = arith.constant 0 : i32
    %c0_i32_0 = arith.constant 0 : i32
    %c0_i32_1 = arith.constant 0 : i32
    return %arg0, %c0_i32, %arg1, %c0_i32_0 : i32, i32, i32, i32
  }
  func.func @transform_6(%arg0: i32, %arg1: i32) -> (i32, i32, i32, i32) {
    %c0_i32 = arith.constant 0 : i32
    %c0_i32_0 = arith.constant 0 : i32
    %c0_i32_1 = arith.constant 0 : i32
    return %arg0, %c0_i32, %arg1, %c0_i32_0 : i32, i32, i32, i32
  }
}

</mosaic_0001>

<bundles_post_ra>
// kernel: tpu_custom_call.1
= control target key start
LH: loop header
LB: loop body
LE: loop exit
PB: predicated region body
PF: predicated region fallthrough
CT: control target
= control target key end

     0   :  { %s1629_s0 = inlined_call_operand.vmem [shape: bf16[2,8,32], index: 0, kind: input, shape index: {}]   ;;  %s1630_s1 = inlined_call_operand.vmem [shape: bf16[4,32,8], index: 1, kind: input, shape index: {}]   ;;  %s1631_s2 = inlined_call_operand.vmem [shape: bf16[4,32,8], index: 2, kind: input, shape index: {}]   ;;  %s1632_s3 = inlined_call_operand.vmem [shape: bf16[4,32,8], index: 3, kind: input, shape index: {}]   ;;  %s1633_s4 = inlined_call_operand.hbm [shape: bf16[2,4,8,8], index: 4, kind: output, shape index: {0}]   ;;  %s1634_s5 = inlined_call_operand.hbm [shape: bf16[2,4,8,8], index: 5, kind: output, shape index: {1}]   ;;  %s1635_s6 = inlined_call_operand.hbm [shape: bf16[2,4,8,8], index: 6, kind: output, shape index: {2}]  }
   0x1   :  { %1639 = sst [smem:[#allocation10_spill]] %s1629_s0 }
   0x2   :  { %1640 = sst [smem:[#allocation11_spill]] %s1630_s1 }
   0x3   :  { %1641 = sst [smem:[#allocation12_spill]] %s1631_s2 }
   0x4   :  { %1642 = sst [smem:[#allocation13_spill]] %s1632_s3 }
   0x5   :  { %12 = vsyncpa [#allocation3], 0 }
   0x6   :  { %14 = vsyncpa [#allocation3 + $0x1], 0 }
   0x7   :  { %15 = vsyncpa [#allocation5], 0 }
   0x8   :  { %17 = vsyncpa [#allocation5 + $0x1], 0  ;;  %s1340_s21 = smov 0   ;;  %s1342_s22 = smov 0  }
   0x9   :  { %s1344_s23 = smov 0   ;;  %s1346_s24 = smov 0  }
   0xa   :  { %s1348_s25 = smov 0   ;;  %s1350_s26 = smov 0  }
   0xb LB: > { %s1637_s27 = sadd.s32 4294967295, %s1301_s26   ;;  %s1636_s28 = sadd.s32 4294967294, %s1301_s26   ;;  %s1301_s26 = sphi %s1350_s26, %s23_s26   ;;  %s1297_s25 = sphi %s1348_s25, %s1657_s25   ;;  %s1293_s24 = sphi %s1346_s24, %s1656_s24   ;;  %s1289_s23 = sphi %s1344_s23, %s1655_s23   ;;  %s1285_s22 = sphi %s1342_s22, %s1654_s22   ;;  %s1281_s21 = sphi %s1340_s21, %s1653_s21  }
   0xc   : > { %s35_s29 = sadd.s32 1, %s1297_s25  ;;  %s135_s30 = sadd.s32 1, %s1289_s23 }
   0xd   : > { %p37_p0 = scmp.ge.s32.totalorder %s35_s29, 2  ;;  %p145_p1 = scmp.ne.s32.totalorder %s1289_s23, %s1285_s22 }
   0xe   : > { %p146_p2 = scmp.eq.s32.totalorder %s1637_s27, 1  ;;  %p151_p3 = scmp.ne.s32.totalorder %s1285_s22, %s1281_s21 }
   0xf   : > { %s1659_s29 = smov (%p37_p0, %s35_s29), 0  ;;  %p152_p5 = scmp.eq.s32.totalorder %s1636_s28, 1 }
  0x10   : > { %1643 = sst [smem:[#allocation9_spill]] %s1659_s29  ;;  %p1382_p4 = por %p146_p2, %p145_p1 }
  0x11   : > { %s130_s8 = ssub.s32 %s1297_s25, %s1659_s29  ;;  %p900_p6 = scmp.ge.s32.totalorder %s1301_s26, 1 }
  0x12   : > { %p133_p7 = scmp.eq.s32.totalorder %s130_s8, 0  ;;  %p1391_p8 = por %p152_p5, %p151_p3 }
  0x13   : > { %p245_p9 = scmp.lt.s32.totalorder %s1301_s26, 3 }
  0x14   : > { %s1397_s10 = scalar_select %p133_p7, %s1289_s23, %s135_s30  }
  0x15   : > { %p246_p10 = pnand %p900_p6, %p245_p9 }
  0x16   : > { %s1646_s1 = sld [smem:[#allocation11_spill]] (!%p246_p10)  ;;  %p287_p11 = scmp.lt.s32.totalorder (!%p246_p10), %s1293_s24, 1 }
  0x17   : > { %249 = sbr.rel (%p246_p10) target bundleno = 228 (0xe4), region = 36  ;;  %s1647_s2 = sld [smem:[#allocation12_spill]] (!%p246_p10) }
  0x18   : > { %s1648_s3 = sld [smem:[#allocation13_spill]] (!%p246_p10)  ;;  %s270_s13 = sand.u32 (!%p246_p10), 1, %s1285_s22  }
  0x19   : > { %s1649_s0 = sld [smem:[#allocation10_spill]] (!%p246_p10)  ;;  %s901_s14 = sshll.u32 (!%p246_p10), %s270_s13, 4 }
  0x1a   : > { %s1491_s15 = scalar_lea.vmem (!%p246_p10), [#allocation2], %s901_s14  ;;  %s1495_s17 = scalar_lea.vmem (!%p246_p10), [#allocation4], %s901_s14 }
  0x1b   : > { %s1510_s18 = sshll.u32 (!%p246_p10), %s1293_s24, 4  ;;  %s715_s30 = sshll.u32 (!%p246_p10), %s1491_s15, 4  ;;  %s716_s30 = int_to_ptr.vmem [resolvable:$true] %s715_s30 }
  0x1c   : > { %v1070_v0 = vld [vmem:[%s1646_s1 + $0x8] sm:$0xff]  ;;  %v1076_v3 = vld [vmem:[%s1646_s1 + $0x18] sm:$0xff]  ;;  %v1069_v4 = vld [vmem:[%s1646_s1] sm:$0xff]  ;;  %s288_s11 = scalar_select %p287_p11, %s1293_s24, 1  ;;  %vm312_vm0 = vcmask 261120   ;;  %vm330_vm1 = vcmask 60416  }
  0x1d   : > { %v1072_v1 = vld [vmem:[%s1647_s2 + $0x8] sm:$0xff]  ;;  %322 = vmatpush.bf16.msra.mxu0 %v1070_v0  ;;  %v1071_v5 = vld [vmem:[%s1647_s2] sm:$0xff]  ;;  %417 = vmatpush.bf16.msra.mxu3 %v1076_v3  ;;  %v1075_v7 = vld [vmem:[%s1646_s1 + $0x10] sm:$0xff]  ;;  %s714_s20 = scalar_lea.hbm %s1633_s4, %s1510_s18  ;;  %s692_s27 = scalar_lea.sflag [#allocation3], %s270_s13 }
  0x1e   : > { %v1074_v2 = vld [vmem:[%s1648_s3 + $0x8] sm:$0xff]  ;;  %354 = vmatpush.bf16.msra.mxu1 %v1072_v1  ;;  %v1073_v6 = vld [vmem:[%s1648_s3] sm:$0xff]  ;;  %s904_s16 = sshll.u32 %s288_s11, 2  ;;  %v1078_v11 = vld [vmem:[%s1647_s2 + $0x18] sm:$0xff]  ;;  %s1521_s8 = sshll.u32 %s714_s20, 4  ;;  %s718_s8 = int_to_ptr.hbm [resolvable:$true] %s1521_s8 }
  0x1f   : > { %385 = vmatpush.bf16.msra.mxu2 %v1074_v2  ;;  %v1082_v8 = vld [vmem:[%s1646_s1 + $0x28] sm:$0xff]  ;;  %s293_s28 = scalar_lea.vmem %s1649_s0, %s904_s16  ;;  %v1080_v12 = vld [vmem:[%s1648_s3 + $0x18] sm:$0xff]  ;;  %v1081_v13 = vld [vmem:[%s1646_s1 + $0x20] sm:$0xff]  ;;  %s1499_s16 = scalar_lea.vmem [#allocation6], %s901_s14 }
  0x20   : > { %v1084_v9 = vld [vmem:[%s1647_s2 + $0x28] sm:$0xff]  ;;  %v295_v10 = vld [vmem:[%s293_s28] sm:$0xf]  ;;  %v1090_v15 = vld [vmem:[%s1647_s2 + $0x38] sm:$0xff]  ;;  %s732_s11 = scalar_lea.hbm %s1634_s5, %s1510_s18  ;;  %s733_s14 = sshll.u32 %s1495_s17, 4  ;;  %s734_s14 = int_to_ptr.vmem [resolvable:$true] %s733_s14 }
  0x21   : > { %323 = vmatpush.bf16.msra.mxu0 %v1069_v4  ;;  %418 = vmatpush.bf16.msra.mxu3 %v1075_v7  ;;  %v1083_v14 = vld [vmem:[%s1647_s2 + $0x20] sm:$0xff]  ;;  %v1092_v16 = vld [vmem:[%s1648_s3 + $0x38] sm:$0xff]  ;;  %v1077_v17 = vld [vmem:[%s1647_s2 + $0x10] sm:$0xff]  ;;  %s750_s20 = scalar_lea.hbm %s1635_s6, %s1510_s18  ;;  %s1177_s0 = sshra.s32 %s718_s8, 4  ;;  %s1178_s0 = int_to_ptr.hbm [resolvable:$true] %s1177_s0 }
  0x22   : > { %355 = vmatpush.bf16.msra.mxu1 %v1071_v5  ;;  %v1079_v18 = vld [vmem:[%s1648_s3 + $0x10] sm:$0xff]  ;;  %v1086_v19 = vld [vmem:[%s1648_s3 + $0x28] sm:$0xff]  ;;  %v1088_v20 = vld [vmem:[%s1646_s1 + $0x38] sm:$0xff]  ;;  %s1183_s24 = scalar_lea.hbm %s1633_s4, 32  ;;  %p1184_p1 = scmp.lt.s32.totalorder %s1178_s0, %s1633_s4 }
  0x23   : > { %386 = vmatpush.bf16.msra.mxu2 %v1073_v6  ;;  %v1089_v21 = vld [vmem:[%s1647_s2 + $0x30] sm:$0xff]  ;;  %v1085_v23 = vld [vmem:[%s1648_s3 + $0x20] sm:$0xff] }
  0x24   : > { %913 = vmatmul.msk.bf16.vlgmr.msra.gmra.mxu0 %vm312_vm0, %v295_v10  ;;  %944 = vmatmul.msk.bf16.vlgmr.msra.gmra.mxu3 %vm312_vm0, %v295_v10  ;;  %v1091_v22 = vld [vmem:[%s1648_s3 + $0x30] sm:$0xff] }
  0x25   : > { %549 = vmatpush.bf16.msrb.mxu3 %v1084_v9  ;;  %922 = vmatmul.msk.bf16.vlgmr.msra.gmra.mxu1 %vm312_vm0, %v295_v10  ;;  %v1087_v24 = vld [vmem:[%s1646_s1 + $0x30] sm:$0xff]  ;;  %s1179_s1 = scalar_lea.hbm %s1178_s0, 16 }
  0x26   : > { %931 = vmatmul.msk.bf16.vlgmr.msra.gmra.mxu2 %vm312_vm0, %v295_v10  ;;  %450 = vmatpush.bf16.msrb.mxu0 %v1078_v11  ;;  %p1180_p12 = scmp.ne.s32.totalorder %s1178_s0, %s1179_s1  ;;  %p1185_p2 = scmp.lt.s32.totalorder %s1183_s24, %s1179_s1 }
  0x27   : > { %516 = vmatpush.bf16.msrb.mxu2 %v1082_v8  ;;  %483 = vmatpush.bf16.msrb.mxu1 %v1080_v12 }
  0x28   : > { %p1181_p13 = pnand %p1180_p12, %p1382_p4  ;;  %p1186_p3 = por %p1185_p2, %p1184_p1 }
  0x29   : > { %550 = vmatpush.bf16.msrb.mxu3 %v1083_v14 }
  0x2a   : > { %451 = vmatpush.bf16.msrb.mxu0 %v1077_v17  ;;  %p1182_p0 = pneg %p1181_p13 }
  0x2b   : > { %517 = vmatpush.bf16.msrb.mxu2 %v1081_v13  ;;  %484 = vmatpush.bf16.msrb.mxu1 %v1079_v18 }
  0x2c   : > { %p1187_p5 = pnand %p1186_p3, %p1182_p0 }
  0x2d   : > { %681 = vmatpush.bf16.msra.mxu3 %v1092_v16 }
  0x2e   : > { %582 = vmatpush.bf16.msra.mxu0 %v1086_v19 }
  0x2f   : > { %648 = vmatpush.bf16.msra.mxu2 %v1090_v15  ;;  %615 = vmatpush.bf16.msra.mxu1 %v1088_v20 }
  0x31   : > { %682 = vmatpush.bf16.msra.mxu3 %v1091_v22 }
  0x32   : > { %583 = vmatpush.bf16.msra.mxu0 %v1085_v23 }
  0x33   : > { %649 = vmatpush.bf16.msra.mxu2 %v1089_v21  ;;  %616 = vmatpush.bf16.msra.mxu1 %v1087_v24 }
  0x34   : > { %958 = vmatmul.msk.bf16.vlgmr.msrb.gmra.mxu0 %vm312_vm0, %v295_v10  ;;  %1000 = vmatmul.msk.bf16.vlgmr.msrb.gmra.mxu3 %vm312_vm0, %v295_v10 }
  0x35   : > { %972 = vmatmul.msk.bf16.vlgmr.msrb.gmra.mxu1 %vm312_vm0, %v295_v10 }
  0x36   : > { %986 = vmatmul.msk.bf16.vlgmr.msrb.gmra.mxu2 %vm312_vm0, %v295_v10 }
  0x44   : > { %1014 = vmatmul.msk.bf16.vlgmr.msra.gmra.mxu0 %vm312_vm0, %v295_v10  ;;  %1056 = vmatmul.msk.bf16.vlgmr.msra.gmra.mxu3 %vm312_vm0, %v295_v10 }
  0x45   : > { %1028 = vmatmul.msk.bf16.vlgmr.msra.gmra.mxu1 %vm312_vm0, %v295_v10 }
  0x46   : > { %1042 = vmatmul.msk.bf16.vlgmr.msra.gmra.mxu2 %vm312_vm0, %v295_v10 }
  0xa1   : > { %v325_v25 = vpop.f32.mrf.mxu0 }
  0xa2   : > { %v357_v26 = vpop.f32.mrf.mxu1  ;;  %v329_v27 = vpack.c.bf16 %v325_v25, %v325_v25 }
  0xa3   : > { %v361_v28 = vpack.c.bf16 %v357_v26, %v357_v26 }
  0xa4   : > { %331 = vst.msk [vmem:[%s1491_s15] sm:$0xf] %vm330_vm1, %v329_v27 }
  0xa5   : > { %362 = vst.msk [vmem:[%s1495_s17] sm:$0xf] %vm330_vm1, %v361_v28 }
  0xa7   : > { %v420_v30 = vpop.f32.mrf.mxu3 }
  0xa8   : > { %v424_v32 = vpack.c.bf16 %v420_v30, %v420_v30 }
  0xa9   : > { %v388_v29 = vpop.f32.mrf.mxu2  ;;  %v327_v33 = vpop.f32.mrf.mxu0 }
  0xaa   : > { %v392_v31 = vpack.c.bf16 %v388_v29, %v388_v29  ;;  %v359_v34 = vpop.f32.mrf.mxu1  ;;  %945 = vst.msk [vmem:[%s1491_s15 + $0x4] sm:$0xf] %vm330_vm1, %v424_v32 }
  0xac   : > { %393 = vst.msk [vmem:[%s1499_s16] sm:$0xf] %vm330_vm1, %v392_v31 }
  0xaf   : > { %v422_v36 = vpop.f32.mrf.mxu3 }
  0xb1   : > { %v390_v35 = vpop.f32.mrf.mxu2  ;;  %v453_v37 = vpop.f32.mrf.mxu0 }
  0xb2   : > { %v486_v38 = vpop.f32.mrf.mxu1  ;;  %v457_v39 = vpack.c.bf16 %v453_v37, %v453_v37 }
  0xb3   : > { %v490_v40 = vpack.c.bf16 %v486_v38, %v486_v38 }
  0xb4   : > { %959 = vst.msk [vmem:[%s1495_s17 + $0x4] sm:$0xf] %vm330_vm1, %v457_v39 }
  0xb5   : > { %973 = vst.msk [vmem:[%s1499_s16 + $0x4] sm:$0xf] %vm330_vm1, %v490_v40 }
  0xb7   : > { %v552_v42 = vpop.f32.mrf.mxu3 }
  0xb8   : > { %v556_v44 = vpack.c.bf16 %v552_v42, %v552_v42 }
  0xb9   : > { %v519_v41 = vpop.f32.mrf.mxu2  ;;  %v455_v45 = vpop.f32.mrf.mxu0 }
  0xba   : > { %v523_v43 = vpack.c.bf16 %v519_v41, %v519_v41  ;;  %v488_v46 = vpop.f32.mrf.mxu1  ;;  %1001 = vst.msk [vmem:[%s1495_s17 + $0x8] sm:$0xf] %vm330_vm1, %v556_v44 }
  0xbc   : > { %987 = vst.msk [vmem:[%s1491_s15 + $0x8] sm:$0xf] %vm330_vm1, %v523_v43 }
  0xbf   : > { %v554_v48 = vpop.f32.mrf.mxu3 }
  0xc1   : > { %v521_v47 = vpop.f32.mrf.mxu2  ;;  %v585_v49 = vpop.f32.mrf.mxu0 }
  0xc2   : > { %v618_v50 = vpop.f32.mrf.mxu1  ;;  %v589_v51 = vpack.c.bf16 %v585_v49, %v585_v49 }
  0xc3   : > { %v622_v52 = vpack.c.bf16 %v618_v50, %v618_v50 }
  0xc4   : > { %1015 = vst.msk [vmem:[%s1499_s16 + $0x8] sm:$0xf] %vm330_vm1, %v589_v51 }
  0xc5   : > { %1029 = vst.msk [vmem:[%s1491_s15 + $0xc] sm:$0xf] %vm330_vm1, %v622_v52 }
  0xc6   : > { %1190 = shalt.err (!%p1187_p5)
}
  0xc7   : > { %s1303_s13 = smov 64   ;;  %s1304_s15 = smov 4   ;;  %v684_v54 = vpop.f32.mrf.mxu3 }
  0xc8   : > { %1096 = dma.vmem_to_hbm [thread:$0]  (%p1382_p4), %s716_s30, 256, %s718_s8, %s692_s27, %s1303_s13, %s1303_s13, %s1304_s15   ;;  %v688_v56 = vpack.c.bf16 %v684_v54, %v684_v54 }
  0xc9   : > { %s1650_s2 = sadd.s32 4294967295, %s1301_s26   ;;  %s1556_s0 = sshll.u32 %s732_s11, 4  ;;  %v651_v53 = vpop.f32.mrf.mxu2  ;;  %v587_v57 = vpop.f32.mrf.mxu0  ;;  %s736_s0 = int_to_ptr.hbm [resolvable:$true] %s1556_s0 }
  0xca   : > { %s1554_s3 = sand.u32 1, %s1650_s2   ;;  %s751_s1 = sshll.u32 %s1499_s16, 4  ;;  %v655_v55 = vpack.c.bf16 %v651_v53, %v651_v53  ;;  %v620_v58 = vpop.f32.mrf.mxu1  ;;  %1057 = vst.msk [vmem:[%s1499_s16 + $0xc] sm:$0xf] %vm330_vm1, %v688_v56  ;;  %s1562_s1 = int_to_ptr.vmem [resolvable:$true] %s751_s1 }
  0xcb   : > { %s1559_s29 = sshll.u32 %s750_s20, 4  ;;  %s697_s27 = scalar_lea.sflag [#allocation5], %s1554_s3  ;;  %s754_s29 = int_to_ptr.hbm [resolvable:$true] %s1559_s29 }
  0xcc   : > { %1043 = vst.msk [vmem:[%s1495_s17 + $0xc] sm:$0xf] %vm330_vm1, %v655_v55  ;;  %s1205_s18 = sshra.s32 %s736_s0, 4  ;;  %s1211_s28 = scalar_lea.hbm %s1634_s5, 32  ;;  %s1206_s18 = int_to_ptr.hbm [resolvable:$true] %s1205_s18 }
  0xcd   : > { %s1207_s30 = scalar_lea.hbm %s1206_s18, 16  ;;  %p1212_p10 = scmp.lt.s32.totalorder %s1206_s18, %s1634_s5 }
  0xce   : > { %p1208_p6 = scmp.ne.s32.totalorder %s1206_s18, %s1207_s30  ;;  %p1213_p11 = scmp.lt.s32.totalorder %s1211_s28, %s1207_s30 }
  0xd0   : > { %p1209_p7 = pnand %p1208_p6, %p1382_p4  ;;  %p1214_p12 = por %p1213_p11, %p1212_p10 }
  0xd2   : > { %p1210_p9 = pneg %p1209_p7 }
  0xd4   : > { %p1215_p13 = pnand %p1214_p12, %p1210_p9 }
  0xd6   : > { %1218 = shalt.err (!%p1215_p13)
}
  0xd7   : > { %1097 = dma.vmem_to_hbm [thread:$0]  (%p1382_p4), %s734_s14, 256, %s736_s0, %s697_s27, %s1303_s13, %s1303_s13, %s1304_s15  }
  0xd8   : > { %s1233_s17 = sshra.s32 %s754_s29, 4  ;;  %s1239_s2 = scalar_lea.hbm %s1635_s6, 32  ;;  %s1234_s17 = int_to_ptr.hbm [resolvable:$true] %s1233_s17 }
  0xd9   : > { %s1235_s16 = scalar_lea.hbm %s1234_s17, 16  ;;  %p1240_p3 = scmp.lt.s32.totalorder %s1234_s17, %s1635_s6 }
  0xda   : > { %p1236_p0 = scmp.ne.s32.totalorder %s1234_s17, %s1235_s16  ;;  %p1241_p5 = scmp.lt.s32.totalorder %s1239_s2, %s1235_s16 }
  0xdc   : > { %p1237_p1 = pnand %p1236_p0, %p1382_p4  ;;  %p1242_p6 = por %p1241_p5, %p1240_p3 }
  0xde   : > { %p1238_p2 = pneg %p1237_p1 }
  0xe0   : > { %p1243_p7 = pnand %p1242_p6, %p1238_p2 }
  0xe2   : > { %1246 = shalt.err (!%p1243_p7)
}
  0xe3   : > { %1098 = dma.vmem_to_hbm [thread:$0]  (%p1382_p4), %s1562_s1, 256, %s754_s29, %s697_s27, %s1303_s13, %s1303_s13, %s1304_s15   ;;  %v653_v59 = vpop.f32.mrf.mxu2  ;;  %v686_v60 = vpop.f32.mrf.mxu3 }
  0xe4 PF: > { %p1112_p9 = scmp.ge.s32.totalorder %s1301_s26, 2  ;;  %s768_s14 = sand.u32 1, %s1281_s21  }
  0xe5   : > { %s769_s7 = scalar_lea.sflag [#allocation3], %s768_s14 }
  0xe6   : > { %p1103_p10 = pnand %p1112_p9, %p1391_p8 }
  0xe8   : > { %p1104_p11 = pneg %p1103_p10 }
  0xea   : > { %1272 = dma.done.wait (%p1104_p11), %s769_s7, 256  }
  0xeb   : > { %1274 = vsyncadd (%p1104_p11), %s769_s7, 4294967040  ;;  %s1651_s3 = sadd.s32 4294967294, %s1301_s26  }
  0xec   : > { %s778_s0 = sand.u32 1, %s1651_s3  }
  0xed   : > { %s779_s8 = scalar_lea.sflag [#allocation5], %s778_s0 }
  0xee   : > { %1276 = dma.done.wait (%p1104_p11), %s779_s8, 512  }
  0xef   : > { %1278 = vsyncadd (%p1104_p11), %s779_s8, 4294966784  ;;  %s23_s26 = sadd.s32 1, %s1301_s26   ;;  %s1652_s13 = sld [smem:[#allocation9_spill]] }
  0xf0   : > { %p20_p4 = scmp.ge.s32.totalorder %s23_s26, 4   ;;  %s1653_s21 = smov %s1285_s22 }
  0xf1   : > { %s1654_s22 = smov %s1289_s23  ;;  %s1655_s23 = smov %s1397_s10 }
  0xf2   : > { %s1656_s24 = smov %s1297_s25  ;;  %22 = sbr.rel (!%p20_p4) target bundleno = 11 (0xb), region = 121 }
  0xf5   : > { %s1657_s25 = smov %s1652_s13 }
  0xf7   :  { %795 = vsyncpa [#allocation3], 1 }
  0xf8   :  { %797 = vsyncpa [#allocation3 + $0x1], 1 }
  0xf9   :  { %798 = vsyncpa [#allocation5], 1 }
  0xfa   :  { %800 = vsyncpa [#allocation5 + $0x1], 1 }

</bundles_post_ra>
